<compile_context>
chip_gen: v5e
topology: v5e:2x2
jax: 0.10.0
libtpu: 0.0.40
codegen_flags: <defaults>
</compile_context>

<pallas_src>
import jax
import jax.numpy as jnp
import numpy as np
from jax.experimental import pallas as pl
from jax.experimental.pallas import tpu as pltpu


def _fused_gather_mlp_kernel(r0_ref, h0_ref,                     # scalar prefetch (SMEM)
                             t_ref, leig_ref, qbias_ref, w1f_ref, w2_ref, b2_ref,
                             out_ref):
    """One (batch-row b, node-tile j) grid step.

    t_ref    : (1, 1, tn)   int32  tail-node ids for this tile
    leig_ref : (1, 1, V, D) bf16   Leig[r0[b], h0[b]] slab (re-DMA'd only on b change)
    qbias_ref: (B, 2D)      f32    resident per-row bias = query @ W1[D:, :] + b1
    w1f_ref  : (D, 2D)      bf16   feature half of the first Linear weight
    w2_ref   : (1, 2D)      f32    second Linear weight as a row
    b2_ref   : (1,)         f32    second Linear bias (SMEM scalar)
    out_ref  : (1, 1, tn)   f32    scores (lane-dense)
    """
    b = pl.program_id(0)
    tids = t_ref[0, 0]                                    # (tn,) int32
    slab = leig_ref[0, 0]                                 # (V, D) bf16
    tn = tids.shape[0]
    V = slab.shape[0]

    # In-kernel gather of the tn tail-node rows via a one-hot MXU matmul
    # (exact: each output row selects exactly one bf16 row of the slab).
    onehot = (tids[:, None] ==
              jax.lax.broadcasted_iota(jnp.int32, (tn, V), 1)).astype(slab.dtype)
    feat = jnp.dot(onehot, slab, preferred_element_type=jnp.float32)
    feat = feat.astype(slab.dtype)                        # exact re-cast (row selection)

    # Linear(2D, 2D) restricted to the feature half; the query half is folded
    # into the per-batch-row bias (resident in VMEM, read once per row).
    h = jnp.dot(feat, w1f_ref[...], preferred_element_type=jnp.float32)   # (tn, 2D)
    qb = qbias_ref[pl.ds(b, 1), :]                        # (1, 2D)
    h = jnp.maximum(h + qb, 0.0)

    # Final (2D -> 1) layer as VPU multiply + lane reduction (an N=1 MXU
    # matmul would waste the systolic array).  Store lane-dense.
    s = jnp.sum(h * w2_ref[...], axis=-1) + b2_ref[0]     # (tn,)
    out_ref[0, 0, :] = s.astype(out_ref.dtype)


def _round_up(x, m):
    return (x + m - 1) // m * m


def fused_score_pallas(Leig_bf16, r0, h0, t_index, qbias, w1f, w2_row, b2,
                       *, max_tn=1024):
    """Fused Leig-gather + 2-layer MLP score.  Returns (B, N) f32 scores."""
    R, V, V2, D = Leig_bf16.shape
    B, N = t_index.shape
    D2 = w1f.shape[1]

    # 128-aligned node tile; pad N so the tile always divides it (padding
    # gathers node 0 and is sliced away afterwards).
    tn = min(max_tn, _round_up(N, 128))
    n_pad = _round_up(N, tn)
    t_pad = t_index if n_pad == N else jnp.pad(t_index, ((0, 0), (0, n_pad - N)))
    t3 = t_pad.reshape(B, 1, n_pad).astype(jnp.int32)

    grid = (B, n_pad // tn)

    out = pl.pallas_call(
        _fused_gather_mlp_kernel,
        out_shape=jax.ShapeDtypeStruct((B, 1, n_pad), jnp.float32),
        grid_spec=pltpu.PrefetchScalarGridSpec(
            num_scalar_prefetch=2,              # r0, h0 -> SMEM, drive Leig index_map
            grid=grid,
            in_specs=[
                # tail indices tile (lane-dense int32)
                pl.BlockSpec((1, 1, tn), lambda b, j, r0s, h0s: (b, 0, j)),
                # Leig slab for this batch row, selected by prefetched scalars
                pl.BlockSpec((1, 1, V, D),
                             lambda b, j, r0s, h0s: (r0s[b], h0s[b], 0, 0)),
                # resident small operands (block index never changes -> one DMA)
                pl.BlockSpec((B, D2), lambda b, j, r0s, h0s: (0, 0)),
                pl.BlockSpec((D, D2), lambda b, j, r0s, h0s: (0, 0)),
                pl.BlockSpec((1, D2), lambda b, j, r0s, h0s: (0, 0)),
                pl.BlockSpec(memory_space=pltpu.MemorySpace.SMEM),
            ],
            out_specs=pl.BlockSpec((1, 1, tn), lambda b, j, r0s, h0s: (b, 0, j)),
        ),
        compiler_params=pltpu.CompilerParams(
            dimension_semantics=("parallel", "parallel")),
    )(r0, h0, t3, Leig_bf16, qbias, w1f, w2_row, b2)

    return out[:, 0, :N]                                           # (B, N)


def nbfnet_dep_eig_forward(params, Leig_bf16, batch, num_relations):
    h_index = batch[..., 0]
    t_index = batch[..., 1]
    r_index = batch[..., 2]
    num_direct_rel = num_relations // 2

    # negative_sample_to_tail (head/tail swap).  As in the original module,
    # h_index and r_index are constant across each batch row after the swap
    # (the PyTorch code asserts this), so per-row [:, 0] indexing is exact.
    is_t_neg = jnp.all(h_index == h_index[:, :1], axis=-1, keepdims=True)
    h2 = jnp.where(is_t_neg, h_index, t_index)
    t2 = jnp.where(is_t_neg, t_index, h_index)
    r2 = jnp.where(is_t_neg, r_index, r_index + num_direct_rel)

    r0 = r2[:, 0].astype(jnp.int32)
    h0 = h2[:, 0].astype(jnp.int32)

    D = Leig_bf16.shape[-1]
    D2 = 2 * D

    # Split W1 so concat([feat, query]) @ W1 == feat @ W1[:D] + query @ W1[D:];
    # the query term is constant over the N negatives of a row -> fold it (and
    # b1) into one tiny (B, 2D) f32 bias, computed here in f32 (exact).
    w1 = params["w1"]
    w1f = w1[:D].astype(jnp.bfloat16)                               # (D, 2D)
    w1q = w1[D:]                                                    # (D, 2D)
    query = params["query_weight"][r0]                              # (B, D)
    qbias = (query @ w1q + params["b1"]).astype(jnp.float32)        # (B, 2D)

    w2_row = params["w2"].reshape(1, D2).astype(jnp.float32)
    b2 = params["b2"].reshape(1).astype(jnp.float32)

    score = fused_score_pallas(Leig_bf16, r0, h0, t2.astype(jnp.int32),
                               qbias, w1f, w2_row, b2)
    return score                                                    # score.view(shape)


def reference_forward(params, Leig, batch, num_relations):
    """Pure-JAX f32 replica of the PyTorch forward (for verification)."""
    h_index = batch[..., 0]
    t_index = batch[..., 1]
    r_index = batch[..., 2]
    B, N = h_index.shape
    nd = num_relations // 2
    is_t_neg = jnp.all(h_index == h_index[:, :1], axis=-1, keepdims=True)
    h2 = jnp.where(is_t_neg, h_index, t_index)
    t2 = jnp.where(is_t_neg, t_index, h_index)
    r2 = jnp.where(is_t_neg, r_index, r_index + nd)
    feature = Leig[r2[:, 0], h2[:, 0]]                       # (B, V, D)
    query = params["query_weight"][r2[:, 0]]                 # (B, D)
    query = jnp.broadcast_to(query[:, None, :],
                             (B, feature.shape[1], query.shape[-1]))
    feature = jnp.concatenate([feature, query], axis=-1)     # (B, V, 2D)
    idx = jnp.broadcast_to(t2[:, :, None], (B, N, feature.shape[-1]))
    feat = jnp.take_along_axis(feature, idx, axis=1)         # (B, N, 2D)
    h = jnp.maximum(feat @ params["w1"] + params["b1"], 0.0)
    s = h @ params["w2"] + params["b2"]
    return s[..., 0]


if __name__ == "__main__":
    key = jax.random.PRNGKey(0)
    B, N = 4, 128           # batch rows, (num_negative + 1)
    D = 64                  # input_dim == feature_dim
    V = 16                  # num_nodes
    num_relations = 4       # total relations (direct + inverse)
    num_direct_rel = num_relations // 2

    ks = jax.random.split(key, 10)

    # Deterministic synthetic parameters (shapes match the module __init__).
    query_weight = jax.random.normal(ks[0], (num_relations, D), jnp.float32)
    w1 = jax.random.normal(ks[1], (2 * D, 2 * D), jnp.float32) * 0.1
    b1 = jax.random.normal(ks[2], (2 * D,), jnp.float32) * 0.1
    w2 = jax.random.normal(ks[3], (2 * D, 1), jnp.float32) * 0.1
    b2 = jax.random.normal(ks[4], (1,), jnp.float32) * 0.1
    params = dict(query_weight=query_weight, w1=w1, b1=b1, w2=w2, b2=b2)

    # Synthetic Leig, standing in for init_lap()'s precomputed eigen features.
    # TODO(synk): LOBPCG-based Laplacian eigen preprocessing not reproduced
    # here; forward() only ever reads the precomputed Leig tensor.
    Leig = jax.random.normal(ks[5], (num_relations, V, V, D), jnp.float32)
    Leig_bf16 = Leig.astype(jnp.bfloat16)   # one-time setup cast (constant tensor)

    # Build a batch (B, N, 3): rows 0..B-2 tail-negative, last row head-neg.
    h0 = jax.random.randint(ks[6], (B,), 0, V)
    t_all = jax.random.randint(ks[7], (B, N), 0, V)
    r0 = jax.random.randint(ks[8], (B,), 0, num_direct_rel)
    h_index = jnp.broadcast_to(h0[:, None], (B, N))
    t_index = t_all
    h_rand = jax.random.randint(ks[9], (N,), 0, V)
    h_rand = h_rand.at[1].set((h_rand[0] + 1) % V)   # guarantee h varies
    h_index = h_index.at[-1].set(h_rand)             # head-negative row
    t_index = t_index.at[-1].set(t_all[-1, 0])       # constant tail
    r_index = jnp.broadcast_to(r0[:, None], (B, N))
    batch = jnp.stack([h_index, t_index, r_index], axis=-1).astype(jnp.int32)

    fwd = jax.jit(
        lambda p, L, b: nbfnet_dep_eig_forward(p, L, b, num_relations))
    score = jax.block_until_ready(fwd(params, Leig_bf16, batch))

    ref = jax.block_until_ready(
        reference_forward(params, Leig, batch, num_relations))

    assert score.shape == (B, N)
    # bf16 Leig/W1f path (f32 MXU accumulate) -> loosened tolerance.
    np.testing.assert_allclose(np.asarray(score), np.asarray(ref),
                               rtol=2e-2, atol=2e-2)
    print("KERNEL_OK")
</pallas_src>

<mosaic_0001>
module attributes {stable_mosaic.version = 11 : i64} {
  func.func @_fused_gather_mlp_kernel(%arg0: i32, %arg1: i32, %arg2: memref<4xi32, #tpu.memory_space<smem>>, %arg3: memref<4xi32, #tpu.memory_space<smem>>, %arg4: memref<1x1x128xi32, #tpu.memory_space<vmem>>, %arg5: memref<1x1x16x64xbf16, #tpu.memory_space<vmem>>, %arg6: memref<4x128xf32, #tpu.memory_space<vmem>>, %arg7: memref<64x128xbf16, #tpu.memory_space<vmem>>, %arg8: memref<1x128xf32, #tpu.memory_space<vmem>>, %arg9: memref<1xf32, #tpu.memory_space<smem>>, %arg10: memref<1x1x128xf32, #tpu.memory_space<vmem>>) attributes {dimension_semantics = [#tpu.dimension_semantics<parallel>, #tpu.dimension_semantics<parallel>], iteration_bounds = array<i64: 4, 1>, scalar_prefetch = 2 : i64, scratch_operands = 0 : i64, tpu.core_type = #tpu.core_type<tc>, window_params = [{transform_indices = @transform_0, window_bounds = array<i64: 1, 1, 128>}, {transform_indices = @transform_1, window_bounds = array<i64: 1, 1, 16, 64>}, {pipeline_mode = #tpu.pipeline_mode<synchronous>, transform_indices = @transform_2, window_bounds = array<i64: 4, 128>}, {pipeline_mode = #tpu.pipeline_mode<synchronous>, transform_indices = @transform_3, window_bounds = array<i64: 64, 128>}, {pipeline_mode = #tpu.pipeline_mode<synchronous>, transform_indices = @transform_4, window_bounds = array<i64: 1, 128>}, {transform_indices = @transform_5, window_bounds = array<i64: 1>}, {transform_indices = @transform_6, window_bounds = array<i64: 1, 1, 128>}]} {
    %c0 = arith.constant 0 : index
    %c0_0 = arith.constant 0 : index
    %c0_1 = arith.constant 0 : index
    %0 = vector.load %arg4[%c0, %c0_0, %c0_1] : memref<1x1x128xi32, #tpu.memory_space<vmem>>, vector<1x1x128xi32>
    %1 = vector.shape_cast %0 : vector<1x1x128xi32> to vector<128xi32>
    %c0_2 = arith.constant 0 : index
    %c0_3 = arith.constant 0 : index
    %c0_4 = arith.constant 0 : index
    %c0_5 = arith.constant 0 : index
    %2 = vector.load %arg5[%c0_2, %c0_3, %c0_4, %c0_5] : memref<1x1x16x64xbf16, #tpu.memory_space<vmem>>, vector<1x1x16x64xbf16>
    %3 = vector.shape_cast %2 : vector<1x1x16x64xbf16> to vector<16x64xbf16>
    %4 = vector.shape_cast %1 : vector<128xi32> to vector<128x1xi32>
    %5 = tpu.iota {dimensions = array<i32: 1>} : vector<128x16xi32>
    %6 = vector.broadcast %4 : vector<128x1xi32> to vector<128x16xi32>
    %7 = arith.cmpi eq, %6, %5 : vector<128x16xi32>
    %8 = arith.extui %7 : vector<128x16xi1> to vector<128x16xi32>
    %9 = arith.sitofp %8 : vector<128x16xi32> to vector<128x16xf32>
    %10 = arith.truncf %9 : vector<128x16xf32> to vector<128x16xbf16>
    %cst = arith.constant dense<0.000000e+00> : vector<128x64xf32>
    %11 = tpu.matmul %10, %3, %cst {dimension_numbers = #tpu.dot_dimension_numbers<[1], [0], [0], [1], [0, 0, 1, 1], [], []>} : vector<128x16xbf16>, vector<16x64xbf16>, vector<128x64xf32> -> vector<128x64xf32>
    %12 = arith.truncf %11 : vector<128x64xf32> to vector<128x64xbf16>
    %c0_6 = arith.constant 0 : index
    %c0_7 = arith.constant 0 : index
    %13 = vector.load %arg7[%c0_6, %c0_7] : memref<64x128xbf16, #tpu.memory_space<vmem>>, vector<64x128xbf16>
    %cst_8 = arith.constant dense<0.000000e+00> : vector<128x128xf32>
    %14 = tpu.matmul %12, %13, %cst_8 {dimension_numbers = #tpu.dot_dimension_numbers<[1], [0], [0], [1], [0, 0, 1, 1], [], []>} : vector<128x64xbf16>, vector<64x128xbf16>, vector<128x128xf32> -> vector<128x128xf32>
    %15 = arith.index_cast %arg0 : i32 to index
    %c0_9 = arith.constant 0 : index
    %16 = vector.load %arg6[%15, %c0_9] : memref<4x128xf32, #tpu.memory_space<vmem>>, vector<1x128xf32>
    %17 = vector.broadcast %16 : vector<1x128xf32> to vector<128x128xf32>
    %18 = arith.addf %14, %17 : vector<128x128xf32>
    %cst_10 = arith.constant 0.000000e+00 : f32
    %19 = vector.broadcast %cst_10 : f32 to vector<128x128xf32>
    %20 = arith.maximumf %18, %19 : vector<128x128xf32>
    %c0_11 = arith.constant 0 : index
    %c0_12 = arith.constant 0 : index
    %21 = vector.load %arg8[%c0_11, %c0_12] : memref<1x128xf32, #tpu.memory_space<vmem>>, vector<1x128xf32>
    %22 = vector.broadcast %21 : vector<1x128xf32> to vector<128x128xf32>
    %23 = arith.mulf %20, %22 : vector<128x128xf32>
    %cst_13 = arith.constant dense<0.000000e+00> : vector<128xf32>
    %24 = vector.multi_reduction <add>, %23, %cst_13 [1] : vector<128x128xf32> to vector<128xf32>
    %c0_14 = arith.constant 0 : index
    %25 = memref.load %arg9[%c0_14] : memref<1xf32, #tpu.memory_space<smem>>
    %26 = vector.broadcast %25 : f32 to vector<128xf32>
    %27 = arith.addf %24, %26 : vector<128xf32>
    %c0_15 = arith.constant 0 : index
    %c0_16 = arith.constant 0 : index
    %c0_17 = arith.constant 0 : index
    %28 = vector.load %arg10[%c0_15, %c0_16, %c0_17] : memref<1x1x128xf32, #tpu.memory_space<vmem>>, vector<1x1x128xf32>
    %29 = vector.shape_cast %28 : vector<1x1x128xf32> to vector<128xf32>
    %30 = vector.shape_cast %27 : vector<128xf32> to vector<1x1x128xf32>
    tpu.vector_store %arg10[%c0_15, %c0_16, %c0_17], %30 {strides = array<i32>} : memref<1x1x128xf32, #tpu.memory_space<vmem>>, vector<1x1x128xf32>,
    return
  }
  func.func @transform_0(%arg0: i32, %arg1: i32, %arg2: memref<4xi32, #tpu.memory_space<smem>>, %arg3: memref<4xi32, #tpu.memory_space<smem>>) -> (i32, i32, i32) {
    %c0_i32 = arith.constant 0 : i32
    %c0_i32_0 = arith.constant 0 : i32
    return %arg0, %c0_i32, %arg1 : i32, i32, i32
  }
  func.func @transform_1(%arg0: i32, %arg1: i32, %arg2: memref<4xi32, #tpu.memory_space<smem>>, %arg3: memref<4xi32, #tpu.memory_space<smem>>) -> (i32, i32, i32, i32) {
    %0 = arith.index_cast %arg0 : i32 to index
    %1 = memref.load %arg2[%0] : memref<4xi32, #tpu.memory_space<smem>>
    %2 = arith.index_cast %arg0 : i32 to index
    %3 = memref.load %arg3[%2] : memref<4xi32, #tpu.memory_space<smem>>
    %c0_i32 = arith.constant 0 : i32
    %c0_i32_0 = arith.constant 0 : i32
    %c0_i32_1 = arith.constant 0 : i32
    return %1, %3, %c0_i32, %c0_i32_0 : i32, i32, i32, i32
  }
  func.func @transform_2(%arg0: i32, %arg1: i32, %arg2: memref<4xi32, #tpu.memory_space<smem>>, %arg3: memref<4xi32, #tpu.memory_space<smem>>) -> (i32, i32) {
    %c0_i32 = arith.constant 0 : i32
    %c0_i32_0 = arith.constant 0 : i32
    %c0_i32_1 = arith.constant 0 : i32
    return %c0_i32, %c0_i32_0 : i32, i32
  }
  func.func @transform_3(%arg0: i32, %arg1: i32, %arg2: memref<4xi32, #tpu.memory_space<smem>>, %arg3: memref<4xi32, #tpu.memory_space<smem>>) -> (i32, i32) {
    %c0_i32 = arith.constant 0 : i32
    %c0_i32_0 = arith.constant 0 : i32
    %c0_i32_1 = arith.constant 0 : i32
    return %c0_i32, %c0_i32_0 : i32, i32
  }
  func.func @transform_4(%arg0: i32, %arg1: i32, %arg2: memref<4xi32, #tpu.memory_space<smem>>, %arg3: memref<4xi32, #tpu.memory_space<smem>>) -> (i32, i32) {
    %c0_i32 = arith.constant 0 : i32
    %c0_i32_0 = arith.constant 0 : i32
    %c0_i32_1 = arith.constant 0 : i32
    return %c0_i32, %c0_i32_0 : i32, i32
  }
  func.func @transform_5(%arg0: i32, %arg1: i32, %arg2: memref<4xi32, #tpu.memory_space<smem>>, %arg3: memref<4xi32, #tpu.memory_space<smem>>) -> i32 {
    %c0_i32 = arith.constant 0 : i32
    %c0_i32_0 = arith.constant 0 : i32
    return %c0_i32 : i32
  }
  func.func @transform_6(%arg0: i32, %arg1: i32, %arg2: memref<4xi32, #tpu.memory_space<smem>>, %arg3: memref<4xi32, #tpu.memory_space<smem>>) -> (i32, i32, i32) {
    %c0_i32 = arith.constant 0 : i32
    %c0_i32_0 = arith.constant 0 : i32
    return %arg0, %c0_i32, %arg1 : i32, i32, i32
  }
}

</mosaic_0001>

<bundles_post_ra>
// kernel: _lambda_.1
= control target key start
LH: loop header
LB: loop body
LE: loop exit
PB: predicated region body
PF: predicated region fallthrough
CT: control target
= control target key end

     0   :  { %s1321_s11 = smov [#allocation3]   ;;  %s1322_s12 = smov [#allocation4]   ;;  %s1705_s0 = inlined_call_operand.vmem [shape: s32[4], index: 0, kind: input, shape index: {}]   ;;  %s1706_s2 = inlined_call_operand.vmem [shape: s32[4,1,128], index: 2, kind: input, shape index: {}]   ;;  %s1707_s3 = inlined_call_operand.hbm [shape: bf16[4,16,16,64], index: 3, kind: input, shape index: {}]   ;;  %s1708_s4 = inlined_call_operand.vmem [shape: f32[4,128], index: 4, kind: input, shape index: {}]   ;;  %s1709_s5 = inlined_call_operand.vmem [shape: bf16[64,128], index: 5, kind: input, shape index: {}]   ;;  %s1710_s6 = inlined_call_operand.vmem [shape: f32[1,128], index: 6, kind: input, shape index: {}]   ;;  %s1711_s8 = inlined_call_operand.hbm [shape: f32[4,1,128], index: 8, kind: output, shape index: {}]   ;;  %s1712_s1 = inlined_call_operand.vmem [shape: s32[4], index: 1, kind: input, shape index: {}]   ;;  %s1713_s7 = inlined_call_operand.<no memory space> [shape: f32[1], index: 7, kind: input, shape index: {}]  }
   0x1   :  { %s14_s29 = sshll.u32 %s1705_s0, 4  ;;  %s19_s10 = sshll.u32 %s1712_s1, 4  ;;  %s15_s29 = int_to_ptr.vmem [resolvable:$true] %s14_s29  ;;  %s20_s10 = int_to_ptr.vmem [resolvable:$true] %s19_s10 }
   0x2   :  { %17 = dma.vmem_to_smem %s15_s29, 16, %s1321_s11, [#allocation2] }
   0x3   :  { %22 = dma.vmem_to_smem %s20_s10, 16, %s1322_s12, [#allocation2] }
   0x4   :  { %23 = sst [smem:[#allocation5]] %s1713_s7 }
   0x5   :  { %1275 = dma.done.wait [#allocation2], 32 }
   0x6   :  { %1276 = vsyncadd [#allocation2], 4294967264 }
   0x7   :  { %26 = sfence }
   0x8   :  { %27 = vsyncpa [#allocation7], 0 }
   0x9   :  { %29 = vsyncpa [#allocation7 + $0x1], 0 }
   0xa   :  { %30 = vsyncpa [#allocation8], 0 }
   0xb   :  { %32 = vsyncpa [#allocation8 + $0x1], 0  ;;  %s1380_s0 = smov 0   ;;  %s1382_s1 = smov 0  }
   0xc   :  { %s1384_s15 = smov 0   ;;  %s1386_s16 = smov 0  }
   0xd   :  { %s1388_s17 = smov 0   ;;  %s1390_s18 = smov 0  }
   0xe   :  { %s1392_s7 = smov 0   ;;  %s1394_s19 = smov 0  }
   0xf   :  { %s1396_s20 = smov 0  }
  0x10 LB: > { %1720 = sst [smem:[#allocation17_spill]] %s1287_s0  ;;  %s964_s21 = sadd.s32 4294967295, %s1319_s20   ;;  %s1319_s20 = sphi %s1396_s20, %s38_s20   ;;  %s1315_s19 = sphi %s1394_s19, %s1741_s19   ;;  %s1311_s7 = sphi %s1392_s7, %s1740_s7   ;;  %s1307_s18 = sphi %s1390_s18, %s1739_s18   ;;  %s1303_s17 = sphi %s1388_s17, %s1745_s17   ;;  %s1299_s16 = sphi %s1386_s16, %s1744_s16   ;;  %s1295_s15 = sphi %s1384_s15, %s1737_s15   ;;  %s1291_s1 = sphi %s1382_s1, %s1743_s1   ;;  %s1287_s0 = sphi %s1380_s0, %s1742_s0  }
  0x11   : > { %1721 = sst [smem:[#allocation18_spill]] %s1295_s15  ;;  %s965_s22 = sadd.s32 4294967294, %s1319_s20  }
  0x12   : > { %1722 = sst [smem:[#allocation19_spill]] %s1307_s18  ;;  %s50_s23 = sadd.s32 1, %s1315_s19 }
  0x13   : > { %1723 = sst [smem:[#allocation20_spill]] %s1315_s19  ;;  %p52_p0 = scmp.ge.s32.totalorder %s50_s23, 4 }
  0x14   : > { %s82_s24 = sld [smem:[#allocation3 + %s1315_s19]]  ;;  %s91_s26 = sadd.s32 1, %s1307_s18 }
  0x15   : > { %s83_s25 = sld [smem:[#allocation4 + %s1315_s19]]  ;;  %p98_p1 = scmp.ne.s32.totalorder %s1307_s18, %s1303_s17 }
  0x16   : > { %s1747_s23 = smov (%p52_p0, %s50_s23), 0  ;;  %p99_p2 = scmp.eq.s32.totalorder %s1319_s20, 0 }
  0x17   : > { %1724 = sst [smem:[#allocation21_spill]] %s1747_s23  ;;  %p104_p3 = scmp.ne.s32.totalorder %s1303_s17, %s1299_s16 }
  0x18   : > { %s84_s27 = sld [smem:[#allocation3 + %s1747_s23]]  ;;  %p105_p4 = scmp.eq.s32.totalorder %s964_s21, 0 }
  0x19   : > { %s85_s28 = sld [smem:[#allocation4 + %s1747_s23]]  ;;  %p1437_p5 = por %p99_p2, %p98_p1 }
  0x1a   : > { %p1441_p6 = por %p105_p4, %p104_p3  ;;  %s198_s9 = ssub.s32 %s1315_s19, %s1747_s23 }
  0x1b   : > { %p201_p7 = scmp.eq.s32.totalorder %s198_s9, 0  ;;  %s203_s10 = sadd.s32 1, %s1295_s15 }
  0x1c   : > { %p213_p8 = scmp.ne.s32.totalorder %s1295_s15, %s1291_s1  ;;  %p214_p9 = scmp.eq.s32.totalorder %s964_s21, 3 }
  0x1d   : > { %s1451_s11 = scalar_select %p201_p7, %s1295_s15, %s203_s10  }
  0x1e   : > { %s86_s12 = ssub.s32 %s82_s24, %s84_s27  ;;  %p1453_p10 = por %p214_p9, %p213_p8 }
  0x1f   : > { %1727 = sst [smem:[#allocation22_spill]] %s1451_s11  ;;  %s87_s14 = ssub.s32 %s83_s25, %s85_s28 }
  0x20   : > { %p219_p11 = scmp.ne.s32.totalorder %s1291_s1, %s1287_s0  ;;  %s88_s16 = sor.u32 %s87_s14, %s86_s12 }
  0x21   : > { %p220_p12 = scmp.eq.s32.totalorder %s965_s22, 3  ;;  %p89_p13 = scmp.eq.s32.totalorder %s88_s16, 0 }
  0x22   : > { %p1058_p1 = scmp.lt.s32.totalorder %s1319_s20, 4  ;;  %s261_s27 = sand.u32 1, %s1307_s18  }
  0x23   : > { %p1459_p0 = por %p220_p12, %p219_p11  ;;  %s968_s10 = sshll.u32 %s261_s27, 3 }
  0x24   : > { %s1465_s21 = scalar_select %p89_p13, %s1307_s18, %s91_s26  }
  0x25   : > { %s1729_s9 = scalar_select %p1459_p0, 1, 0 }
  0x26   : > { %1731 = sst [smem:[#allocation24_spill]] %s1465_s21  ;;  %p1469_p2 = pnand %p1058_p1, %p1437_p5 }
  0x27   : > { %1730 = sst [smem:[#allocation23_spill]] %s1729_s9  ;;  %p972_p3 = scmp.ge.s32.totalorder %s1319_s20, 1 }
  0x28   : > { %s1038_s25 = scalar_select %p1437_p5, [#allocation3], [#allocation10] }
  0x29   : > { %s1039_s22 = scalar_select %p1437_p5, %s1315_s19, 0 }
  0x2a   : > { %s1749_s25 = smov (!%p1058_p1, %s1038_s25), [#allocation12]  ;;  %p285_p4 = scmp.lt.s32.totalorder %s1319_s20, 5 }
  0x2b   : > { %s1751_s22 = smov (!%p1058_p1, %s1039_s22), 0  ;;  %s265_s23 = scalar_lea.vmem [#allocation6], %s968_s10 }
  0x2c   : > { %s1040_s28 = scalar_select %p1437_p5, [#allocation4], [#allocation11] }
  0x2d   : > { %s266_s12 = sld [smem:[%s1749_s25 + %s1751_s22]]  ;;  %p1483_p7 = pnand %p972_p3, %p285_p4 }
  0x2e   : > { %s1753_s28 = smov (!%p1058_p1, %s1040_s28), [#allocation13]  ;;  %s1487_s21 = sshll.u32 %s265_s23, 4  ;;  %s278_s21 = int_to_ptr.vmem [resolvable:$true] %s1487_s21 }
  0x2f   : > { %s267_s14 = sld [smem:[%s1753_s28 + %s1751_s22]]  ;;  %s262_s15 = scalar_lea.sflag [#allocation7], %s261_s27 }
  0x30   : > { %p1185_p8 = pneg %p1469_p2 }
  0x33   : > { %s970_s16 = sshll.u32 %s266_s12, 5 }
  0x35   : > { %s969_s19 = sshll.u32 %s267_s14, 1 }
  0x36   : > { %s272_s18 = sadd.s32 %s970_s16, %s969_s19  ;;  %s1188_s19 = scalar_lea.hbm %s1707_s3, 512 }
  0x37   : > { %s971_s29 = sshll.u32 %s272_s18, 2 }
  0x38   : > { %s274_s22 = scalar_lea.hbm %s1707_s3, %s971_s29 }
  0x39   : > { %s275_s28 = sshll.u32 %s274_s22, 4  ;;  %s276_s28 = int_to_ptr.hbm [resolvable:$true] %s275_s28 }
  0x3a   : > { %s1181_s9 = sshra.s32 %s276_s28, 4  ;;  %s1182_s9 = int_to_ptr.hbm [resolvable:$true] %s1181_s9 }
  0x3b   : > { %s1183_s0 = scalar_lea.hbm %s1182_s9, 8  ;;  %p1189_p12 = scmp.lt.s32.totalorder %s1182_s9, %s1707_s3 }
  0x3c   : > { %p1184_p5 = scmp.ne.s32.totalorder %s1182_s9, %s1183_s0  ;;  %p1190_p13 = scmp.lt.s32.totalorder %s1188_s19, %s1183_s0 }
  0x3e   : > { %p1186_p9 = pnand %p1185_p8, %p1184_p5  ;;  %p1191_p1 = por %p1190_p13, %p1189_p12 }
  0x40   : > { %p1187_p11 = pneg %p1186_p9 }
  0x42   : > { %p1192_p3 = pnand %p1191_p1, %p1187_p11 }
  0x44   : > { %1195 = shalt.err (!%p1192_p3)
}
  0x45   : > { %s1323_s11 = smov 64   ;;  %s1324_s27 = smov 4  }
  0x46   : > { %1053 = dma.hbm_to_vmem [thread:$0]  (!%p1469_p2), %s276_s28, 128, %s278_s21, %s262_s15, %s1323_s11, %s1323_s11, %s1324_s27  }
  0x47   : > { %289 = sbr.rel (%p1483_p7) target bundleno = 742 (0x2e6), region = 44  ;;  %s291_s14 = sand.u32 (!%p1483_p7), 1, %s1303_s17  }
  0x48   : > { %s1506_s16 = sshll.u32 (!%p1483_p7), %s291_s14, 3  ;;  %s292_s29 = scalar_lea.sflag (!%p1483_p7), [#allocation7], %s291_s14 }
  0x49   : > { %s295_s9 = scalar_lea.vmem (!%p1483_p7), [#allocation6], %s1506_s16 }
  0x4c   : > { %1278 = dma.done.wait (%p1441_p6), %s292_s29, 128  }
  0x4d   : > { %1280 = vsyncadd (%p1441_p6), %s292_s29, 4294967168  ;;  %v343_v0 = vlaneseq  ;;  %p330_p2 = scmp.lt.s32.totalorder %s1311_s7, 3  ;;  %v1028_v18 = vld [vmem:[%s295_s9] sm:$0xff]  ;;  %v1325_v23 = vmov 0.0   ;;  %vm503_vm2 = vcmask 130048   ;;  %v1032_v48 = vld [vmem:[%s1709_s5 + $0x18] sm:$0xff]  ;;  %s593_s11 = scalar_lea.vmem %s1708_s4, %s1311_s7 }
  0x4e   : > { %535 = vmatpush.bf16.msra.mxu0 %v1028_v18  ;;  %1033 = vmatpush.bf16.msra.mxu3 %v1028_v18  ;;  %v1031_v62 = vld [vmem:[%s1709_s5 + $0x10] sm:$0xff]  ;;  %v1030_v63 = vld [vmem:[%s1709_s5 + $0x8] sm:$0xff]  ;;  %s762_s9 = sld [smem:[#allocation5]]  ;;  %s1231_s19 = scalar_lea.hbm %s1711_s8, 4 }
  0x4f   : > { %v344_v1 = vshrl.u32 %v343_v0, 7  ;;  %s331_s0 = scalar_select %p330_p2, %s1311_s7, 3  ;;  %v1520_v20 = vand.u32 127, %v343_v0  ;;  %649 = vmatpush.bf16.msra.mxu1 %v1032_v48  ;;  %1034 = vmatpush.bf16.msra.mxu2 %v1032_v48  ;;  %v1029_v0 = vld [vmem:[%s1709_s5] sm:$0xff] }
  0x51   : > { %1137 = vset.pattern.permute.xlu0 %v344_v1  ;;  %v357_v2 = vadd.s32 16, %v344_v1  ;;  %v369_v3 = vadd.s32 32, %v344_v1  ;;  %s335_s24 = scalar_lea.vmem %s1706_s2, %s331_s0  ;;  %v351_v5 = vadd.s32 8, %v344_v1  ;;  %v363_v6 = vadd.s32 24, %v344_v1  ;;  %s328_s0 = sand.u32 1, %s1291_s1  }
  0x52   : > { %v1154_v4 = vld [vmem:[%s335_s24] ss:$0 sm:$0xff]  ;;  %v375_v7 = vadd.s32 40, %v344_v1  ;;  %v393_v8 = vadd.s32 64, %v344_v1  ;;  %v381_v9 = vadd.s32 48, %v344_v1  ;;  %v387_v10 = vadd.s32 56, %v344_v1  ;;  %s869_s24 = scalar_lea.hbm %s1711_s8, %s1311_s7 }
  0x53   : > { %1139 = vset.pattern.permute.xlu1 %v357_v2  ;;  %1141 = vset.pattern.permute.xlu2 %v369_v3  ;;  %v423_v11 = vadd.s32 104, %v344_v1  ;;  %v399_v12 = vadd.s32 72, %v344_v1  ;;  %v405_v13 = vadd.s32 80, %v344_v1  ;;  %v411_v14 = vadd.s32 88, %v344_v1  ;;  %s329_s30 = scalar_lea.vmem [#allocation9], %s328_s0  ;;  %s873_s7 = sshll.u32 %s869_s24, 4  ;;  %s874_s7 = int_to_ptr.hbm [resolvable:$true] %s873_s7 }
  0x54   : > { %v417_v15 = vadd.s32 96, %v344_v1  ;;  %v429_v16 = vadd.s32 112, %v344_v1  ;;  %v435_v17 = vadd.s32 120, %v344_v1  ;;  %650 = vmatpush.bf16.msra.mxu1 %v1031_v62  ;;  %1035 = vmatpush.bf16.msra.mxu2 %v1031_v62  ;;  %s871_s26 = sshll.u32 %s329_s30, 4  ;;  %s860_s25 = scalar_lea.sflag [#allocation8], %s328_s0  ;;  %s872_s26 = int_to_ptr.vmem [resolvable:$true] %s871_s26 }
  0x55   : > { %s1225_s22 = sshra.s32 %s874_s7, 4  ;;  %s1226_s22 = int_to_ptr.hbm [resolvable:$true] %s1225_s22 }
  0x56   : > { %s1227_s28 = scalar_lea.hbm %s1226_s22, 1  ;;  %p1232_p5 = scmp.lt.s32.totalorder %s1226_s22, %s1711_s8 }
  0x57   : > { %p1228_p6 = scmp.ne.s32.totalorder %s1226_s22, %s1227_s28  ;;  %p1233_p8 = scmp.lt.s32.totalorder %s1231_s19, %s1227_s28 }
  0x58   : > { %651 = vmatpush.bf16.msra.mxu1 %v1030_v63  ;;  %1036 = vmatpush.bf16.msra.mxu2 %v1030_v63 }
  0x59   : > { %347 = vperm.xlu0 %1137, %v1154_v4   ;;  %p1229_p4 = pnand %p1228_p6, %p1453_p10  ;;  %p1234_p9 = por %p1233_p8, %p1232_p5 }
  0x5b   : > { %359 = vperm.xlu1 %1139, %v1154_v4   ;;  %371 = vperm.xlu2 %1141, %v1154_v4   ;;  %p1230_p7 = pneg %p1229_p4 }
  0x5c   : > { %652 = vmatpush.bf16.msra.mxu1 %v1029_v0  ;;  %1037 = vmatpush.bf16.msra.mxu2 %v1029_v0 }
  0x5d   : > { %p1235_p11 = pnand %p1234_p9, %p1230_p7 }
  0x61   : > { %1138 = vset.pattern.permute.xlu0 %v351_v5 }
  0x63   : > { %1140 = vset.pattern.permute.xlu1 %v363_v6  ;;  %1142 = vset.pattern.permute.xlu2 %v375_v7 }
  0x69   : > { %353 = vperm.xlu0 %1138, %v1154_v4  }
  0x6b   : > { %365 = vperm.xlu1 %1140, %v1154_v4   ;;  %377 = vperm.xlu2 %1142, %v1154_v4  }
  0x71   : > { %1145 = vset.pattern.permute.xlu0 %v393_v8 }
  0x73   : > { %1143 = vset.pattern.permute.xlu1 %v381_v9  ;;  %1144 = vset.pattern.permute.xlu2 %v387_v10 }
  0x79   : > { %395 = vperm.xlu0 %1145, %v1154_v4  }
  0x7b   : > { %383 = vperm.xlu1 %1143, %v1154_v4   ;;  %389 = vperm.xlu2 %1144, %v1154_v4  }
  0x81   : > { %1150 = vset.pattern.permute.xlu0 %v423_v11 }
  0x83   : > { %1146 = vset.pattern.permute.xlu1 %v399_v12  ;;  %1147 = vset.pattern.permute.xlu2 %v405_v13 }
  0x89   : > { %425 = vperm.xlu0 %1150, %v1154_v4  }
  0x8b   : > { %401 = vperm.xlu1 %1146, %v1154_v4   ;;  %407 = vperm.xlu2 %1147, %v1154_v4  }
  0x91   : > { %1153 = vset.pattern.permute.xlu0 %v435_v17 }
  0x93   : > { %1148 = vset.pattern.permute.xlu1 %v411_v14  ;;  %1149 = vset.pattern.permute.xlu2 %v417_v15 }
  0x9b   : > { %413 = vperm.xlu1 %1148, %v1154_v4   ;;  %419 = vperm.xlu2 %1149, %v1154_v4  }
  0xa3   : > { %1151 = vset.pattern.permute.xlu1 %v429_v16  ;;  %1152 = vset.pattern.permute.xlu2 %v435_v17 }
  0xab   : > { %431 = vperm.xlu1 %1151, %v1154_v4   ;;  %437 = vperm.xlu2 %1152, %v1154_v4  }
  0xb5   : > { %v372_v29 = vpop.permute.xlu2 %371 }
  0xb6   : > { %vm445_vm5 = vcmp.eq.s32.totalorder %v372_v29, %v1520_v20  ;;  %v1581_v29 = vld [vmem:[%s1710_s6] ss:$0 sm:$0xff] }
  0xb7   : > { %v978_v33 = vsel %vm445_vm5, 1.0, %v1325_v23  ;;  %vm811_vm5 = vcmask 326912  }
  0xc5   : > { %v378_v32 = vpop.permute.xlu2 %377 }
  0xc6   : > { %vm446_vm6 = vcmp.eq.s32.totalorder %v378_v32, %v1520_v20 }
  0xc7   : > { %v979_v34 = vsel %vm446_vm6, 1.0, %v1325_v23  ;;  %vm815_vm6 = vcmask 392512  }
  0xc8   : > { %v491_v36 = vpack.c.bf16 %v979_v34, %v978_v33 }
  0xcb   : > { %v348_v19 = vpop.permute.xlu0 %347 }
  0xcc   : > { %vm441_vm0 = vcmp.eq.s32.totalorder %v348_v19, %v1520_v20 }
  0xcd   : > { %v360_v21 = vpop.permute.xlu1 %359  ;;  %v974_v24 = vsel %vm441_vm0, 1.0, %v1325_v23 }
  0xce   : > { %vm443_vm4 = vcmp.eq.s32.totalorder %v360_v21, %v1520_v20 }
  0xcf   : > { %v976_v30 = vsel %vm443_vm4, 1.0, %v1325_v23  ;;  %vm807_vm4 = vcmask 261312  }
  0xd5   : > { %v390_v37 = vpop.permute.xlu2 %389 }
  0xd6   : > { %vm448_vm7 = vcmp.eq.s32.totalorder %v390_v37, %v1520_v20 }
  0xd7   : > { %v981_v40 = vsel %vm448_vm7, 1.0, %v1325_v23  ;;  %vm819_vm7 = vcmask 458112  }
  0xdb   : > { %v354_v22 = vpop.permute.xlu0 %353 }
  0xdc   : > { %vm442_vm1 = vcmp.eq.s32.totalorder %v354_v22, %v1520_v20 }
  0xdd   : > { %v975_v25 = vsel %vm442_vm1, 1.0, %v1325_v23  ;;  %v366_v27 = vpop.permute.xlu1 %365  ;;  %vm620_vm1 = vcmask 523264  }
  0xde   : > { %v489_v26 = vpack.c.bf16 %v975_v25, %v974_v24  ;;  %vm444_vm3 = vcmp.eq.s32.totalorder %v366_v27, %v1520_v20 }
  0xdf   : > { %v977_v28 = vsel %vm444_vm3, 1.0, %v1325_v23  ;;  %vm803_vm3 = vcmask 195712  }
  0xe0   : > { %994 = vmatmul.msk.bf16.vlgmr.msra.gmra.mxu0 %vm503_vm2, %v489_v26  ;;  %v490_v31 = vpack.c.bf16 %v977_v28, %v976_v30  ;;  %v1575_v26 = vld [vmem:[%s593_s11] ss:$0 sm:$0xff] }
  0xe5   : > { %v408_v39 = vpop.permute.xlu2 %407 }
  0xe6   : > { %vm451_vm9 = vcmp.eq.s32.totalorder %v408_v39, %v1520_v20 }
  0xe7   : > { %v984_v43 = vsel %vm451_vm9, 1.0, %v1325_v23  ;;  %vm827_vm9 = vcmask 589312  }
  0xeb   : > { %v396_v42 = vpop.permute.xlu0 %395 }
  0xec   : > { %vm449_vm12 = vcmp.eq.s32.totalorder %v396_v42, %v1520_v20 }
  0xed   : > { %v384_v35 = vpop.permute.xlu1 %383  ;;  %v982_v52 = vsel %vm449_vm12, 1.0, %v1325_v23  ;;  %vm839_vm12 = vcmask 786112  }
  0xee   : > { %vm447_vm8 = vcmp.eq.s32.totalorder %v384_v35, %v1520_v20 }
  0xef   : > { %v980_v41 = vsel %vm447_vm8, 1.0, %v1325_v23  ;;  %vm823_vm8 = vcmask 523712  }
  0xf0   : > { %995 = vmatmul.msk.bf16.gmra.mxu0 %vm503_vm2, %v490_v31  ;;  %v492_v45 = vpack.c.bf16 %v981_v40, %v980_v41 }
  0xf5   : > { %v420_v49 = vpop.permute.xlu2 %419 }
  0xf6   : > { %vm453_vm13 = vcmp.eq.s32.totalorder %v420_v49, %v1520_v20 }
  0xf7   : > { %v986_v53 = vsel %vm453_vm13, 1.0, %v1325_v23  ;;  %vm843_vm13 = vcmask 851712  }
  0xfb   : > { %v426_v50 = vpop.permute.xlu0 %425 }
  0xfc   : > { %vm454_vm14 = vcmp.eq.s32.totalorder %v426_v50, %v1520_v20 }
  0xfd   : > { %v402_v38 = vpop.permute.xlu1 %401  ;;  %v987_v54 = vsel %vm454_vm14, 1.0, %v1325_v23  ;;  %vm847_vm14 = vcmask 917312  }
  0xfe   : > { %vm450_vm11 = vcmp.eq.s32.totalorder %v402_v38, %v1520_v20  ;;  %v495_v56 = vpack.c.bf16 %v987_v54, %v986_v53 }
  0xff   : > { %v983_v51 = vsel %vm450_vm11, 1.0, %v1325_v23  ;;  %vm835_vm11 = vcmask 720512  }
 0x100   : > { %996 = vmatmul.msk.bf16.gmra.mxu0 %vm503_vm2, %v491_v36  ;;  %v493_v55 = vpack.c.bf16 %v983_v51, %v982_v52 }
 0x105   : > { %v438_v57 = vpop.permute.xlu2 %437 }
 0x106   : > { %vm456_vm15 = vcmp.eq.s32.totalorder %v438_v57, %v1520_v20 }
 0x107   : > { %v989_v59 = vsel %vm456_vm15, 1.0, %v1325_v23  ;;  %vm851_vm15 = vcmask 982912  }
 0x10d   : > { %v414_v44 = vpop.permute.xlu1 %413 }
 0x10e   : > { %vm452_vm10 = vcmp.eq.s32.totalorder %v414_v44, %v1520_v20 }
 0x10f   : > { %v985_v46 = vsel %vm452_vm10, 1.0, %v1325_v23  ;;  %vm831_vm10 = vcmask 654912  }
 0x110   : > { %997 = vmatmul.msk.bf16.gmra.mxu0 %vm503_vm2, %v492_v45  ;;  %v494_v47 = vpack.c.bf16 %v985_v46, %v984_v43 }
 0x112   : > { %999 = vmatmul.msk.bf16.vlgmr.msra.gmra.mxu3 %vm503_vm2, %v494_v47 }
 0x11d   : > { %v432_v58 = vpop.permute.xlu1 %431 }
 0x11e   : > { %vm455_vm0 = vcmp.eq.s32.totalorder %v432_v58, %v1520_v20 }
 0x11f   : > { %v988_v60 = vsel %vm455_vm0, 1.0, %v1325_v23  ;;  %vm855_vm0 = vcmask 1048512  }
 0x120   : > { %998 = vmatmul.msk.bf16.gmra.mxu0 %vm503_vm2, %v493_v55  ;;  %v496_v61 = vpack.c.bf16 %v989_v59, %v988_v60 }
 0x122   : > { %1000 = vmatmul.msk.bf16.gmra.mxu3 %vm503_vm2, %v495_v56 }
 0x132   : > { %1001 = vmatmul.msk.bf16.gmra.mxu3 %vm503_vm2, %v496_v61  ;;  %vm799_vm2 = vcmask 130112  }
 0x15d   : > { %v537_v1 = vpop.f32.mrf.mxu0 }
 0x165   : > { %v539_v2 = vpop.f32.mrf.mxu0 }
 0x166   : > { %v577_v3 = vpack.c.bf16 %v539_v2, %v537_v1 }
 0x168   : > { %1018 = vmatmul.msk.bf16.vlgmr.msra.gmra.mxu1 %vm620_vm1, %v577_v3 }
 0x16d   : > { %v542_v4 = vpop.f32.mrf.mxu0 }
 0x175   : > { %v544_v5 = vpop.f32.mrf.mxu0 }
 0x176   : > { %v578_v6 = vpack.c.bf16 %v544_v5, %v542_v4 }
 0x178   : > { %1019 = vmatmul.msk.bf16.gmra.mxu1 %vm620_vm1, %v578_v6 }
 0x17d   : > { %v547_v7 = vpop.f32.mrf.mxu0 }
 0x185   : > { %v549_v8 = vpop.f32.mrf.mxu0 }
 0x186   : > { %v579_v9 = vpack.c.bf16 %v549_v8, %v547_v7 }
 0x188   : > { %1020 = vmatmul.msk.bf16.gmra.mxu1 %vm620_vm1, %v579_v9 }
 0x18d   : > { %v552_v10 = vpop.f32.mrf.mxu0 }
 0x195   : > { %v554_v11 = vpop.f32.mrf.mxu0  ;;  %v562_v14 = vpop.f32.mrf.mxu3 }
 0x196   : > { %v580_v12 = vpack.c.bf16 %v554_v11, %v552_v10 }
 0x198   : > { %1021 = vmatmul.msk.bf16.gmra.mxu1 %vm620_vm1, %v580_v12 }
 0x19d   : > { %v557_v13 = vpop.f32.mrf.mxu0  ;;  %v564_v17 = vpop.f32.mrf.mxu3 }
 0x19e   : > { %v582_v19 = vpack.c.bf16 %v564_v17, %v562_v14 }
 0x1a5   : > { %v559_v15 = vpop.f32.mrf.mxu0  ;;  %v567_v18 = vpop.f32.mrf.mxu3 }
 0x1a6   : > { %v581_v16 = vpack.c.bf16 %v559_v15, %v557_v13 }
 0x1a8   : > { %1022 = vmatmul.msk.bf16.vlgmr.msra.gmra.mxu2 %vm620_vm1, %v581_v16 }
 0x1ad   : > { %v569_v21 = vpop.f32.mrf.mxu3 }
 0x1ae   : > { %v583_v22 = vpack.c.bf16 %v569_v21, %v567_v18 }
 0x1b5   : > { %v572_v23 = vpop.f32.mrf.mxu3 }
 0x1b8   : > { %1023 = vmatmul.msk.bf16.gmra.mxu2 %vm620_vm1, %v582_v19 }
 0x1bd   : > { %v574_v24 = vpop.f32.mrf.mxu3 }
 0x1be   : > { %v584_v25 = vpack.c.bf16 %v574_v24, %v572_v23 }
 0x1c8   : > { %1024 = vmatmul.msk.bf16.gmra.mxu2 %vm620_vm1, %v583_v22 }
 0x1d8   : > { %1025 = vmatmul.msk.bf16.gmra.mxu2 %vm620_vm1, %v584_v25 }
 0x1e5   : > { %v654_v27 = vpop.f32.mrf.mxu1 }
 0x1e6   : > { %v655_v28 = vadd.f32 %v1575_v26, %v654_v27 }
 0x1e8   : > { %v694_v30 = vmax.f32 %v655_v28, 0.0 }
 0x1ea   : > { %v714_v31 = vmul.f32 %v1581_v29, %v694_v30 }
 0x1ec   : > { %730 = vadd.xlane.f32.xlu1 %v714_v31 }
 0x1ed   : > { %v656_v32 = vpop.f32.mrf.mxu1 }
 0x1ee   : > { %v657_v33 = vadd.f32 %v1575_v26, %v656_v32 }
 0x1f0   : > { %v695_v34 = vmax.f32 %v657_v33, 0.0 }
 0x1f2   : > { %v715_v35 = vmul.f32 %v1581_v29, %v695_v34 }
 0x1f4   : > { %732 = vadd.xlane.f32.xlu2 %v715_v35 }
 0x1f5   : > { %v659_v36 = vpop.f32.mrf.mxu1 }
 0x1f6   : > { %v660_v37 = vadd.f32 %v1575_v26, %v659_v36 }
 0x1f8   : > { %v696_v38 = vmax.f32 %v660_v37, 0.0 }
 0x1fa   : > { %v716_v39 = vmul.f32 %v1581_v29, %v696_v38 }
 0x1fc   : > { %734 = vadd.xlane.f32.xlu0 %v716_v39 }
 0x1fd   : > { %v661_v40 = vpop.f32.mrf.mxu1 }
 0x1fe   : > { %v662_v41 = vadd.f32 %v1575_v26, %v661_v40  ;;  %v1614_v40 = vstv %s762_s9 }
 0x200   : > { %v697_v42 = vmax.f32 %v662_v41, 0.0  ;;  %v797_v41 = vadd.s32 4294967288, %v1520_v20 }
 0x202   : > { %v717_v43 = vmul.f32 %v1581_v29, %v697_v42 }
 0x204   : > { %736 = vadd.xlane.f32.xlu2 %v717_v43 }
 0x205   : > { %v664_v44 = vpop.f32.mrf.mxu1 }
 0x206   : > { %v665_v45 = vadd.f32 %v1575_v26, %v664_v44  ;;  %v805_v44 = vadd.s32 4294967272, %v1520_v20 }
 0x208   : > { %v698_v46 = vmax.f32 %v665_v45, 0.0 }
 0x20a   : > { %v718_v47 = vmul.f32 %v1581_v29, %v698_v46 }
 0x20c   : > { %738 = vadd.xlane.f32.xlu1 %v718_v47 }
 0x20d   : > { %v666_v48 = vpop.f32.mrf.mxu1 }
 0x20e   : > { %v667_v49 = vadd.f32 %v1575_v26, %v666_v48 }
 0x210   : > { %v699_v50 = vmax.f32 %v667_v49, 0.0  ;;  %v809_v49 = vadd.s32 4294967264, %v1520_v20 }
 0x212   : > { %v719_v51 = vmul.f32 %v1581_v29, %v699_v50 }
 0x214   : > { %740 = vadd.xlane.f32.xlu2 %v719_v51 }
 0x215   : > { %v669_v52 = vpop.f32.mrf.mxu1 }
 0x216   : > { %v670_v53 = vadd.f32 %v1575_v26, %v669_v52 }
 0x218   : > { %v700_v54 = vmax.f32 %v670_v53, 0.0 }
 0x21a   : > { %v720_v55 = vmul.f32 %v1581_v29, %v700_v54 }
 0x21c   : > { %742 = vadd.xlane.f32.xlu0 %v720_v55  ;;  %v813_v55 = vadd.s32 4294967256, %v1520_v20 }
 0x21d   : > { %v671_v56 = vpop.f32.mrf.mxu1 }
 0x21e   : > { %v672_v57 = vadd.f32 %v1575_v26, %v671_v56 }
 0x220   : > { %v701_v58 = vmax.f32 %v672_v57, 0.0 }
 0x222   : > { %v721_v59 = vmul.f32 %v1581_v29, %v701_v58  ;;  %v817_v58 = vadd.s32 4294967248, %v1520_v20 }
 0x224   : > { %744 = vadd.xlane.f32.xlu1 %v721_v59 }
 0x22b   : > { %v674_v60 = vpop.f32.mrf.mxu2 }
 0x22c   : > { %v675_v61 = vadd.f32 %v1575_v26, %v674_v60 }
 0x22e   : > { %v702_v62 = vmax.f32 %v675_v61, 0.0  ;;  %v821_v61 = vadd.s32 4294967240, %v1520_v20 }
 0x230   : > { %v722_v63 = vmul.f32 %v1581_v29, %v702_v62 }
 0x232   : > { %746 = vadd.xlane.f32.xlu2 %v722_v63 }
 0x233   : > { %v676_v0 = vpop.f32.mrf.mxu2 }
 0x234   : > { %v677_v1 = vadd.f32 %v1575_v26, %v676_v0  ;;  %v825_v0 = vadd.s32 4294967232, %v1520_v20 }
 0x236   : > { %v703_v2 = vmax.f32 %v677_v1, 0.0 }
 0x238   : > { %v723_v3 = vmul.f32 %v1581_v29, %v703_v2 }
 0x23a   : > { %748 = vadd.xlane.f32.xlu0 %v723_v3 }
 0x23b   : > { %v679_v4 = vpop.f32.mrf.mxu2 }
 0x23c   : > { %v680_v5 = vadd.f32 %v1575_v26, %v679_v4  ;;  %v829_v4 = vadd.s32 4294967224, %v1520_v20 }
 0x23e   : > { %v704_v6 = vmax.f32 %v680_v5, 0.0 }
 0x240   : > { %v724_v7 = vmul.f32 %v1581_v29, %v704_v6 }
 0x242   : > { %750 = vadd.xlane.f32.xlu1 %v724_v7 }
 0x243   : > { %v681_v8 = vpop.f32.mrf.mxu2 }
 0x244   : > { %v682_v9 = vadd.f32 %v1575_v26, %v681_v8  ;;  %v833_v8 = vadd.s32 4294967216, %v1520_v20 }
 0x246   : > { %v705_v10 = vmax.f32 %v682_v9, 0.0 }
 0x248   : > { %v725_v11 = vmul.f32 %v1581_v29, %v705_v10 }
 0x24a   : > { %752 = vadd.xlane.f32.xlu2 %v725_v11 }
 0x24b   : > { %v684_v12 = vpop.f32.mrf.mxu2 }
 0x24c   : > { %v685_v13 = vadd.f32 %v1575_v26, %v684_v12 }
 0x24e   : > { %v706_v14 = vmax.f32 %v685_v13, 0.0  ;;  %v837_v13 = vadd.s32 4294967208, %v1520_v20 }
 0x250   : > { %v726_v15 = vmul.f32 %v1581_v29, %v706_v14 }
 0x252   : > { %754 = vadd.xlane.f32.xlu0 %v726_v15 }
 0x253   : > { %v686_v16 = vpop.f32.mrf.mxu2 }
 0x254   : > { %v687_v17 = vadd.f32 %v1575_v26, %v686_v16 }
 0x256   : > { %v707_v18 = vmax.f32 %v687_v17, 0.0  ;;  %v841_v17 = vadd.s32 4294967200, %v1520_v20 }
 0x258   : > { %v727_v19 = vmul.f32 %v1581_v29, %v707_v18 }
 0x25a   : > { %756 = vadd.xlane.f32.xlu1 %v727_v19 }
 0x25b   : > { %v689_v21 = vpop.f32.mrf.mxu2 }
 0x25c   : > { %v690_v22 = vadd.f32 %v1575_v26, %v689_v21 }
 0x25e   : > { %v708_v23 = vmax.f32 %v690_v22, 0.0  ;;  %v845_v22 = vadd.s32 4294967192, %v1520_v20 }
 0x25f   : > { %v731_v32 = vpop.xlane.xlu1 %730 }
 0x260   : > { %v728_v24 = vmul.f32 %v1581_v29, %v708_v23  ;;  %v764_v42 = vadd.f32 %v1614_v40, %v731_v32 }
 0x262   : > { %758 = vadd.xlane.f32.xlu2 %v728_v24  ;;  %v796_v52 = vperm.slane %v764_v42, %v1520_v20 }
 0x263   : > { %v691_v25 = vpop.f32.mrf.mxu2 }
 0x264   : > { %v692_v27 = vadd.f32 %v1575_v26, %v691_v25 }
 0x266   : > { %v709_v28 = vmax.f32 %v692_v27, 0.0  ;;  %v849_v27 = vadd.s32 4294967184, %v1520_v20 }
 0x267   : > { %v733_v31 = vpop.xlane.xlu2 %732 }
 0x268   : > { %v729_v30 = vmul.f32 %v1581_v29, %v709_v28  ;;  %v765_v26 = vadd.f32 %v1614_v40, %v733_v31  ;;  %v801_v29 = vadd.s32 4294967280, %v1520_v20 }
 0x26a   : > { %760 = vadd.xlane.f32.xlu0 %v729_v30  ;;  %v798_v47 = vperm.slane %v765_v26, %v797_v41 }
 0x26c   : > { %v800_v57 = vsel %vm799_vm2, %v798_v47, %v796_v52 }
 0x26f   : > { %v735_v34 = vpop.xlane.xlu0 %734 }
 0x270   : > { %v766_v43 = vadd.f32 %v1614_v40, %v735_v34 }
 0x272   : > { %v802_v53 = vperm.slane %v766_v43, %v801_v29 }
 0x274   : > { %v804_v63 = vsel %vm803_vm3, %v802_v53, %v800_v57 }
 0x277   : > { %v737_v33 = vpop.xlane.xlu2 %736 }
 0x278   : > { %v767_v45 = vadd.f32 %v1614_v40, %v737_v33 }
 0x27a   : > { %v806_v54 = vperm.slane %v767_v45, %v805_v44 }
 0x27c   : > { %v808_v2 = vsel %vm807_vm4, %v806_v54, %v804_v63 }
 0x27f   : > { %v739_v35 = vpop.xlane.xlu1 %738 }
 0x280   : > { %v768_v50 = vadd.f32 %v1614_v40, %v739_v35 }
 0x282   : > { %v810_v60 = vperm.slane %v768_v50, %v809_v49 }
 0x284   : > { %v812_v11 = vsel %vm811_vm5, %v810_v60, %v808_v2 }
 0x287   : > { %v741_v36 = vpop.xlane.xlu2 %740 }
 0x288   : > { %v769_v56 = vadd.f32 %v1614_v40, %v741_v36  ;;  %v853_v36 = vadd.s32 4294967176, %v1520_v20 }
 0x28a   : > { %v814_v3 = vperm.slane %v769_v56, %v813_v55 }
 0x28c   : > { %v816_v19 = vsel %vm815_vm6, %v814_v3, %v812_v11 }
 0x28f   : > { %v743_v37 = vpop.xlane.xlu0 %742 }
 0x290   : > { %v770_v59 = vadd.f32 %v1614_v40, %v743_v37 }
 0x292   : > { %v818_v7 = vperm.slane %v770_v59, %v817_v58 }
 0x294   : > { %v820_v24 = vsel %vm819_vm7, %v818_v7, %v816_v19 }
 0x297   : > { %v745_v38 = vpop.xlane.xlu1 %744 }
 0x298   : > { %v771_v62 = vadd.f32 %v1614_v40, %v745_v38 }
 0x29a   : > { %v822_v12 = vperm.slane %v771_v62, %v821_v61 }
 0x29c   : > { %v824_v30 = vsel %vm823_vm8, %v822_v12, %v820_v24 }
 0x2a5   : > { %v747_v39 = vpop.xlane.xlu2 %746 }
 0x2a6   : > { %v772_v1 = vadd.f32 %v1614_v40, %v747_v39 }
 0x2a8   : > { %v826_v16 = vperm.slane %v772_v1, %v825_v0 }
 0x2aa   : > { %v828_v32 = vsel %vm827_vm9, %v826_v16, %v824_v30 }
 0x2ad   : > { %v749_v46 = vpop.xlane.xlu0 %748 }
 0x2ae   : > { %v773_v5 = vadd.f32 %v1614_v40, %v749_v46 }
 0x2b0   : > { %v830_v21 = vperm.slane %v773_v5, %v829_v4 }
 0x2b2   : > { %v832_v34 = vsel %vm831_vm10, %v830_v21, %v828_v32 }
 0x2b5   : > { %v751_v48 = vpop.xlane.xlu1 %750 }
 0x2b6   : > { %v774_v9 = vadd.f32 %v1614_v40, %v751_v48 }
 0x2b8   : > { %v834_v25 = vperm.slane %v774_v9, %v833_v8 }
 0x2ba   : > { %v836_v37 = vsel %vm835_vm11, %v834_v25, %v832_v34 }
 0x2bd   : > { %v753_v51 = vpop.xlane.xlu2 %752 }
 0x2be   : > { %v775_v14 = vadd.f32 %v1614_v40, %v753_v51 }
 0x2c0   : > { %v838_v31 = vperm.slane %v775_v14, %v837_v13 }
 0x2c2   : > { %v840_v41 = vsel %vm839_vm12, %v838_v31, %v836_v37 }
 0x2c5   : > { %v755_v6 = vpop.xlane.xlu0 %754 }
 0x2c6   : > { %v776_v18 = vadd.f32 %v1614_v40, %v755_v6 }
 0x2c8   : > { %v842_v33 = vperm.slane %v776_v18, %v841_v17 }
 0x2ca   : > { %v844_v42 = vsel %vm843_vm13, %v842_v33, %v840_v41 }
 0x2cd   : > { %v757_v10 = vpop.xlane.xlu1 %756 }
 0x2ce   : > { %v777_v23 = vadd.f32 %v1614_v40, %v757_v10 }
 0x2d0   : > { %v846_v35 = vperm.slane %v777_v23, %v845_v22 }
 0x2d2   : > { %v848_v29 = vsel %vm847_vm14, %v846_v35, %v844_v42 }
 0x2d5   : > { %v759_v15 = vpop.xlane.xlu2 %758 }
 0x2d6   : > { %v778_v28 = vadd.f32 %v1614_v40, %v759_v15 }
 0x2d8   : > { %v850_v38 = vperm.slane %v778_v28, %v849_v27 }
 0x2da   : > { %v852_v44 = vsel %vm851_vm15, %v850_v38, %v848_v29 }
 0x2dd   : > { %v761_v39 = vpop.xlane.xlu0 %760 }
 0x2de   : > { %v779_v26 = vadd.f32 %v1614_v40, %v761_v39 }
 0x2e0   : > { %v854_v43 = vperm.slane %v779_v26, %v853_v36 }
 0x2e2   : > { %v856_v20 = vsel %vm855_vm0, %v854_v43, %v852_v44 }
 0x2e3   : > { %858 = vst [vmem:[%s329_s30] sm:$0x1] %v856_v20 }
 0x2e4   : > { %1238 = shalt.err (!%p1235_p11)
}
 0x2e5   : > { %1044 = dma.vmem_to_hbm [thread:$0]  (%p1453_p10), %s872_s26, 16, %s874_s7, %s860_s25  }
 0x2e6 PF: > { %s1734_s11 = sld [smem:[#allocation17_spill]]  ;;  %p1059_p12 = scmp.ge.s32.totalorder %s1319_s20, 2 }
 0x2e8   : > { %p1055_p13 = pnand %p1059_p12, %p1459_p0 }
 0x2ea   : > { %p1056_p1 = pneg %p1055_p13 }
 0x2ec   : > { %s885_s14 = sand.u32 1, %s1734_s11  }
 0x2ed   : > { %s886_s16 = scalar_lea.sflag [#allocation8], %s885_s14 }
 0x2ee   : > { %1282 = dma.done.wait (%p1056_p1), %s886_s16, 16  }
 0x2ef   : > { %1284 = vsyncadd (%p1056_p1), %s886_s16, 4294967280  ;;  %s38_s20 = sadd.s32 1, %s1319_s20   ;;  %s1736_s29 = sld [smem:[#allocation18_spill]] }
 0x2f0   : > { %p35_p3 = scmp.ge.s32.totalorder %s38_s20, 6   ;;  %s1737_s15 = sld [smem:[#allocation22_spill]] }
 0x2f1   : > { %s1738_s13 = sld [smem:[#allocation19_spill]]  ;;  %s1742_s0 = smov %s1291_s1 }
 0x2f2   : > { %s1739_s18 = sld [smem:[#allocation24_spill]]  ;;  %s1744_s16 = smov %s1303_s17 }
 0x2f3   : > { %s1740_s7 = sld [smem:[#allocation20_spill]]  ;;  %37 = sbr.rel (!%p35_p3) target bundleno = 16 (0x10), region = 93 }
 0x2f4   : > { %s1741_s19 = sld [smem:[#allocation21_spill]] }
 0x2f5   : > { %s1743_s1 = smov %s1736_s29 }
 0x2f7   : > { %s1745_s17 = smov %s1738_s13 }
 0x2f8   :  { %891 = vsyncpa [#allocation7], 1 }
 0x2f9   :  { %893 = vsyncpa [#allocation7 + $0x1], 1 }
 0x2fa   :  { %894 = vsyncpa [#allocation8], 1 }
 0x2fb   :  { %896 = vsyncpa [#allocation8 + $0x1], 1 }

</bundles_post_ra>
